<compile_context>
chip_gen: v7x
topology: tpu7x:2x2x1
jax: 0.10.0
libtpu: 0.0.40
codegen_flags: <defaults>
</compile_context>

<pallas_src>
import jax
import jax.numpy as jnp
from jax import lax
from jax.experimental import pallas as pl
from jax.experimental.pallas import tpu as pltpu


INPUT_SIZE = 37
H1, H2, H3, OUT = 20, 10, 5, 1


def _sigmoid(h):
    # One EUP transcendental (tanh); the 0.5*(..)+1 cleanup rides idle VALU slots.
    return 0.5 * (jnp.tanh(0.5 * h) + 1.0)


def _mlp_kernel(x_ref,
                w1_ref, b1_ref,
                w2_ref, b2_ref,
                w3_ref, b3_ref,
                w4_ref, b4_ref,
                o_ref):
    # Layer 1: contract w1 (20, 37) dim-1 against x (tb, 37) dim-1 -> (20, tb).
    # No materialized transpose of the x tile; batch lands on the lane axis.
    h = _sigmoid(
        lax.dot_general(w1_ref[...], x_ref[...],
                        dimension_numbers=(((1,), (1,)), ((), ())),
                        preferred_element_type=jnp.float32)
        + b1_ref[...])                                                        # (20, tb)

    h = _sigmoid(jnp.dot(w2_ref[...], h,
                         preferred_element_type=jnp.float32) + b2_ref[...])   # (10, tb)
    h = _sigmoid(jnp.dot(w3_ref[...], h,
                         preferred_element_type=jnp.float32) + b3_ref[...])   # (5, tb)
    h = _sigmoid(jnp.dot(w4_ref[...], h,
                         preferred_element_type=jnp.float32) + b4_ref[...])   # (1, tb)

    o_ref[...] = h   # lane-dense (1, tb) store


def _choose_tb(batch, requested_tb):
    """Pick a batch tile: multiple of 128, amortizes per-step overhead, and
    keeps the grid at >= 2 steps when the batch allows it (v7x megacore)."""
    tb = max(128, min(requested_tb, pl.cdiv(batch, 128) * 128))
    n_tiles = pl.cdiv(batch, tb)
    if n_tiles < 2 and batch > 128:
        # Split into (at least) two tiles so both TensorCores get work and
        # the input DMA pipeline has something to overlap with.
        tb = max(128, pl.cdiv(batch, 2 * 128) * 128)
    return tb


def nn3_hidden_layer_forward(x, params, *, tb=8192):
    """x: (B, INPUT_SIZE) f32.  params: PyTorch-layout weights (out, in), biases (out, 1)."""
    B = x.shape[0]
    tb = _choose_tb(B, tb)
    b_pad = pl.cdiv(B, tb) * tb
    if b_pad != B:
        x = jnp.pad(x, ((0, b_pad - B), (0, 0)))

    # VMEM budget: x tile (tb, 37) lane-pads to (tb, 128) -> tb*512 B/buffer,
    # x2 for double buffering, plus ~tb*300 B of (H, tb) intermediates and the
    # double-buffered (1, tb) output.  tb*2048 B covers all of it with slack.
    vmem_limit = int(max(32 << 20, min(60 << 20, tb * 2048 + (4 << 20))))

    const = lambda i: (0, 0)
    out = pl.pallas_call(
        _mlp_kernel,
        out_shape=jax.ShapeDtypeStruct((1, b_pad), jnp.float32),
        grid=(b_pad // tb,),
        in_specs=[
            pl.BlockSpec((tb, INPUT_SIZE), lambda i: (i, 0)),   # x: tiled over batch
            pl.BlockSpec((H1, INPUT_SIZE), const),              # weights/biases stay resident
            pl.BlockSpec((H1, 1), const),
            pl.BlockSpec((H2, H1), const),
            pl.BlockSpec((H2, 1), const),
            pl.BlockSpec((H3, H2), const),
            pl.BlockSpec((H3, 1), const),
            pl.BlockSpec((OUT, H3), const),
            pl.BlockSpec((OUT, 1), const),
        ],
        out_specs=pl.BlockSpec((1, tb), lambda i: (0, i)),
        compiler_params=pltpu.CompilerParams(
            dimension_semantics=("parallel",),
            vmem_limit_bytes=vmem_limit),
    )(x,
      params["w1"], params["b1"],
      params["w2"], params["b2"],
      params["w3"], params["b3"],
      params["w4"], params["b4"])

    # (1, b_pad) -> (B, 1); padded rows are dropped.
    return out[0, :B].reshape(B, 1)


def init_params(key):
    """Deterministic init mimicking nn.Linear's uniform(-1/sqrt(fan_in), 1/sqrt(fan_in)).

    Weights stored PyTorch-native as (out_features, in_features); biases as (out, 1)
    so the kernel broadcasts them across the lane (batch) axis.
    """
    def linear(key, fan_in, fan_out):
        kw, kb = jax.random.split(key)
        bound = 1.0 / jnp.sqrt(fan_in)
        w = jax.random.uniform(kw, (fan_out, fan_in), jnp.float32, -bound, bound)
        b = jax.random.uniform(kb, (fan_out, 1), jnp.float32, -bound, bound)
        return w, b

    k1, k2, k3, k4 = jax.random.split(key, 4)
    w1, b1 = linear(k1, INPUT_SIZE, H1)
    w2, b2 = linear(k2, H1, H2)
    w3, b3 = linear(k3, H2, H3)
    w4, b4 = linear(k4, H3, OUT)
    return dict(w1=w1, b1=b1, w2=w2, b2=b2, w3=w3, b3=b3, w4=w4, b4=b4)


def _reference(x, p):
    h = jax.nn.sigmoid(x @ p["w1"].T + p["b1"].T)
    h = jax.nn.sigmoid(h @ p["w2"].T + p["b2"].T)
    h = jax.nn.sigmoid(h @ p["w3"].T + p["b3"].T)
    return jax.nn.sigmoid(h @ p["w4"].T + p["b4"].T)


if __name__ == "__main__":
    key = jax.random.PRNGKey(0)
    kx, kx2, kp = jax.random.split(key, 3)
    params = init_params(kp)

    # Small batch (single 128-row tile, heavy padding path).
    B = 8
    x = jax.random.normal(kx, (B, INPUT_SIZE), dtype=jnp.float32)
    out = jax.block_until_ready(nn3_hidden_layer_forward(x, params))
    ref = _reference(x, params)
    assert out.shape == (B, OUT), out.shape
    assert jnp.allclose(out, ref, atol=1e-5, rtol=1e-5), "mismatch vs reference (B=8)"

    # Moderate batch: exercises multi-tile grid + batch padding.
    B2 = 1000
    x2 = jax.random.normal(kx2, (B2, INPUT_SIZE), dtype=jnp.float32)
    out2 = jax.block_until_ready(nn3_hidden_layer_forward(x2, params))
    ref2 = _reference(x2, params)
    assert out2.shape == (B2, OUT), out2.shape
    assert jnp.allclose(out2, ref2, atol=1e-5, rtol=1e-5), "mismatch vs reference (B=1000)"

    print("KERNEL_OK")
</pallas_src>

<mosaic_0001>
module attributes {stable_mosaic.version = 11 : i64} {
  func.func @_mlp_kernel(%arg0: i32, %arg1: memref<128x37xf32, #tpu.memory_space<vmem>>, %arg2: memref<20x37xf32, #tpu.memory_space<vmem>>, %arg3: memref<20x1xf32, #tpu.memory_space<vmem>>, %arg4: memref<10x20xf32, #tpu.memory_space<vmem>>, %arg5: memref<10x1xf32, #tpu.memory_space<vmem>>, %arg6: memref<5x10xf32, #tpu.memory_space<vmem>>, %arg7: memref<5x1xf32, #tpu.memory_space<vmem>>, %arg8: memref<1x5xf32, #tpu.memory_space<vmem>>, %arg9: memref<1x1xf32, #tpu.memory_space<vmem>>, %arg10: memref<1x128xf32, #tpu.memory_space<vmem>>) attributes {dimension_semantics = [#tpu.dimension_semantics<parallel>], iteration_bounds = array<i64: 1>, scalar_prefetch = 0 : i64, scratch_operands = 0 : i64, tpu.core_type = #tpu.core_type<tc>, window_params = [{transform_indices = @transform_0, window_bounds = array<i64: 128, 37>}, {pipeline_mode = #tpu.pipeline_mode<synchronous>, transform_indices = @transform_1, window_bounds = array<i64: 20, 37>}, {pipeline_mode = #tpu.pipeline_mode<synchronous>, transform_indices = @transform_2, window_bounds = array<i64: 20, 1>}, {pipeline_mode = #tpu.pipeline_mode<synchronous>, transform_indices = @transform_3, window_bounds = array<i64: 10, 20>}, {pipeline_mode = #tpu.pipeline_mode<synchronous>, transform_indices = @transform_4, window_bounds = array<i64: 10, 1>}, {pipeline_mode = #tpu.pipeline_mode<synchronous>, transform_indices = @transform_5, window_bounds = array<i64: 5, 10>}, {pipeline_mode = #tpu.pipeline_mode<synchronous>, transform_indices = @transform_6, window_bounds = array<i64: 5, 1>}, {pipeline_mode = #tpu.pipeline_mode<synchronous>, transform_indices = @transform_7, window_bounds = array<i64: 1, 5>}, {pipeline_mode = #tpu.pipeline_mode<synchronous>, transform_indices = @transform_8, window_bounds = array<i64: 1, 1>}, {transform_indices = @transform_9, window_bounds = array<i64: 1, 128>}]} {
    %c0 = arith.constant 0 : index
    %c0_0 = arith.constant 0 : index
    %0 = vector.load %arg2[%c0, %c0_0] : memref<20x37xf32, #tpu.memory_space<vmem>>, vector<20x37xf32>
    %c0_1 = arith.constant 0 : index
    %c0_2 = arith.constant 0 : index
    %1 = vector.load %arg1[%c0_1, %c0_2] : memref<128x37xf32, #tpu.memory_space<vmem>>, vector<128x37xf32>
    %cst = arith.constant dense<0.000000e+00> : vector<20x128xf32>
    %2 = tpu.matmul %0, %1, %cst {dimension_numbers = #tpu.dot_dimension_numbers<[1], [1], [0], [0], [0, 0, 1, 0], [], []>} : vector<20x37xf32>, vector<128x37xf32>, vector<20x128xf32> -> vector<20x128xf32>
    %c0_3 = arith.constant 0 : index
    %c0_4 = arith.constant 0 : index
    %3 = vector.load %arg3[%c0_3, %c0_4] : memref<20x1xf32, #tpu.memory_space<vmem>>, vector<20x1xf32>
    %4 = vector.broadcast %3 : vector<20x1xf32> to vector<20x128xf32>
    %5 = arith.addf %2, %4 : vector<20x128xf32>
    %cst_5 = arith.constant 5.000000e-01 : f32
    %6 = vector.broadcast %cst_5 : f32 to vector<20x128xf32>
    %7 = arith.mulf %6, %5 : vector<20x128xf32>
    %8 = math.tanh %7 : vector<20x128xf32>
    %cst_6 = arith.constant 1.000000e+00 : f32
    %9 = vector.broadcast %cst_6 : f32 to vector<20x128xf32>
    %10 = arith.addf %8, %9 : vector<20x128xf32>
    %cst_7 = arith.constant 5.000000e-01 : f32
    %11 = vector.broadcast %cst_7 : f32 to vector<20x128xf32>
    %12 = arith.mulf %11, %10 : vector<20x128xf32>
    %c0_8 = arith.constant 0 : index
    %c0_9 = arith.constant 0 : index
    %13 = vector.load %arg4[%c0_8, %c0_9] : memref<10x20xf32, #tpu.memory_space<vmem>>, vector<10x20xf32>
    %cst_10 = arith.constant dense<0.000000e+00> : vector<10x128xf32>
    %14 = tpu.matmul %13, %12, %cst_10 {dimension_numbers = #tpu.dot_dimension_numbers<[1], [0], [0], [1], [0, 0, 1, 1], [], []>} : vector<10x20xf32>, vector<20x128xf32>, vector<10x128xf32> -> vector<10x128xf32>
    %c0_11 = arith.constant 0 : index
    %c0_12 = arith.constant 0 : index
    %15 = vector.load %arg5[%c0_11, %c0_12] : memref<10x1xf32, #tpu.memory_space<vmem>>, vector<10x1xf32>
    %16 = vector.broadcast %15 : vector<10x1xf32> to vector<10x128xf32>
    %17 = arith.addf %14, %16 : vector<10x128xf32>
    %cst_13 = arith.constant 5.000000e-01 : f32
    %18 = vector.broadcast %cst_13 : f32 to vector<10x128xf32>
    %19 = arith.mulf %18, %17 : vector<10x128xf32>
    %20 = math.tanh %19 : vector<10x128xf32>
    %cst_14 = arith.constant 1.000000e+00 : f32
    %21 = vector.broadcast %cst_14 : f32 to vector<10x128xf32>
    %22 = arith.addf %20, %21 : vector<10x128xf32>
    %cst_15 = arith.constant 5.000000e-01 : f32
    %23 = vector.broadcast %cst_15 : f32 to vector<10x128xf32>
    %24 = arith.mulf %23, %22 : vector<10x128xf32>
    %c0_16 = arith.constant 0 : index
    %c0_17 = arith.constant 0 : index
    %25 = vector.load %arg6[%c0_16, %c0_17] : memref<5x10xf32, #tpu.memory_space<vmem>>, vector<5x10xf32>
    %cst_18 = arith.constant dense<0.000000e+00> : vector<5x128xf32>
    %26 = tpu.matmul %25, %24, %cst_18 {dimension_numbers = #tpu.dot_dimension_numbers<[1], [0], [0], [1], [0, 0, 1, 1], [], []>} : vector<5x10xf32>, vector<10x128xf32>, vector<5x128xf32> -> vector<5x128xf32>
    %c0_19 = arith.constant 0 : index
    %c0_20 = arith.constant 0 : index
    %27 = vector.load %arg7[%c0_19, %c0_20] : memref<5x1xf32, #tpu.memory_space<vmem>>, vector<5x1xf32>
    %28 = vector.broadcast %27 : vector<5x1xf32> to vector<5x128xf32>
    %29 = arith.addf %26, %28 : vector<5x128xf32>
    %cst_21 = arith.constant 5.000000e-01 : f32
    %30 = vector.broadcast %cst_21 : f32 to vector<5x128xf32>
    %31 = arith.mulf %30, %29 : vector<5x128xf32>
    %32 = math.tanh %31 : vector<5x128xf32>
    %cst_22 = arith.constant 1.000000e+00 : f32
    %33 = vector.broadcast %cst_22 : f32 to vector<5x128xf32>
    %34 = arith.addf %32, %33 : vector<5x128xf32>
    %cst_23 = arith.constant 5.000000e-01 : f32
    %35 = vector.broadcast %cst_23 : f32 to vector<5x128xf32>
    %36 = arith.mulf %35, %34 : vector<5x128xf32>
    %c0_24 = arith.constant 0 : index
    %c0_25 = arith.constant 0 : index
    %37 = vector.load %arg8[%c0_24, %c0_25] : memref<1x5xf32, #tpu.memory_space<vmem>>, vector<1x5xf32>
    %cst_26 = arith.constant dense<0.000000e+00> : vector<1x128xf32>
    %38 = tpu.matmul %37, %36, %cst_26 {dimension_numbers = #tpu.dot_dimension_numbers<[1], [0], [0], [1], [0, 0, 1, 1], [], []>} : vector<1x5xf32>, vector<5x128xf32>, vector<1x128xf32> -> vector<1x128xf32>
    %c0_27 = arith.constant 0 : index
    %c0_28 = arith.constant 0 : index
    %39 = vector.load %arg9[%c0_27, %c0_28] : memref<1x1xf32, #tpu.memory_space<vmem>>, vector<1x1xf32>
    %40 = vector.broadcast %39 : vector<1x1xf32> to vector<1x128xf32>
    %41 = arith.addf %38, %40 : vector<1x128xf32>
    %cst_29 = arith.constant 5.000000e-01 : f32
    %42 = vector.broadcast %cst_29 : f32 to vector<1x128xf32>
    %43 = arith.mulf %42, %41 : vector<1x128xf32>
    %44 = math.tanh %43 : vector<1x128xf32>
    %cst_30 = arith.constant 1.000000e+00 : f32
    %45 = vector.broadcast %cst_30 : f32 to vector<1x128xf32>
    %46 = arith.addf %44, %45 : vector<1x128xf32>
    %cst_31 = arith.constant 5.000000e-01 : f32
    %47 = vector.broadcast %cst_31 : f32 to vector<1x128xf32>
    %48 = arith.mulf %47, %46 : vector<1x128xf32>
    %c0_32 = arith.constant 0 : index
    %c0_33 = arith.constant 0 : index
    %49 = vector.load %arg10[%c0_32, %c0_33] : memref<1x128xf32, #tpu.memory_space<vmem>>, vector<1x128xf32>
    tpu.vector_store %arg10[%c0_32, %c0_33], %48 {strides = array<i32>} : memref<1x128xf32, #tpu.memory_space<vmem>>, vector<1x128xf32>,
    return
  }
  func.func @transform_0(%arg0: i32) -> (i32, i32) {
    %c0_i32 = arith.constant 0 : i32
    %c0_i32_0 = arith.constant 0 : i32
    return %arg0, %c0_i32 : i32, i32
  }
  func.func @transform_1(%arg0: i32) -> (i32, i32) {
    %c0_i32 = arith.constant 0 : i32
    %c0_i32_0 = arith.constant 0 : i32
    %c0_i32_1 = arith.constant 0 : i32
    return %c0_i32, %c0_i32_0 : i32, i32
  }
  func.func @transform_2(%arg0: i32) -> (i32, i32) {
    %c0_i32 = arith.constant 0 : i32
    %c0_i32_0 = arith.constant 0 : i32
    %c0_i32_1 = arith.constant 0 : i32
    return %c0_i32, %c0_i32_0 : i32, i32
  }
  func.func @transform_3(%arg0: i32) -> (i32, i32) {
    %c0_i32 = arith.constant 0 : i32
    %c0_i32_0 = arith.constant 0 : i32
    %c0_i32_1 = arith.constant 0 : i32
    return %c0_i32, %c0_i32_0 : i32, i32
  }
  func.func @transform_4(%arg0: i32) -> (i32, i32) {
    %c0_i32 = arith.constant 0 : i32
    %c0_i32_0 = arith.constant 0 : i32
    %c0_i32_1 = arith.constant 0 : i32
    return %c0_i32, %c0_i32_0 : i32, i32
  }
  func.func @transform_5(%arg0: i32) -> (i32, i32) {
    %c0_i32 = arith.constant 0 : i32
    %c0_i32_0 = arith.constant 0 : i32
    %c0_i32_1 = arith.constant 0 : i32
    return %c0_i32, %c0_i32_0 : i32, i32
  }
  func.func @transform_6(%arg0: i32) -> (i32, i32) {
    %c0_i32 = arith.constant 0 : i32
    %c0_i32_0 = arith.constant 0 : i32
    %c0_i32_1 = arith.constant 0 : i32
    return %c0_i32, %c0_i32_0 : i32, i32
  }
  func.func @transform_7(%arg0: i32) -> (i32, i32) {
    %c0_i32 = arith.constant 0 : i32
    %c0_i32_0 = arith.constant 0 : i32
    %c0_i32_1 = arith.constant 0 : i32
    return %c0_i32, %c0_i32_0 : i32, i32
  }
  func.func @transform_8(%arg0: i32) -> (i32, i32) {
    %c0_i32 = arith.constant 0 : i32
    %c0_i32_0 = arith.constant 0 : i32
    %c0_i32_1 = arith.constant 0 : i32
    return %c0_i32, %c0_i32_0 : i32, i32
  }
  func.func @transform_9(%arg0: i32) -> (i32, i32) {
    %c0_i32 = arith.constant 0 : i32
    %c0_i32_0 = arith.constant 0 : i32
    return %c0_i32, %arg0 : i32, i32
  }
}

</mosaic_0001>

<bundles_post_ra>
// kernel: tpu_custom_call.1
= control target key start
LH: loop header
LB: loop body
LE: loop exit
PB: predicated region body
PF: predicated region fallthrough
CT: control target
= control target key end

     0   :  { %s935_s0 = inlined_call_operand.vmem [shape: f32[128,37], index: 0, kind: input, shape index: {}]   ;;  %s936_s1 = inlined_call_operand.vmem [shape: f32[20,37], index: 1, kind: input, shape index: {}]   ;;  %s937_s2 = inlined_call_operand.vmem [shape: f32[20,1], index: 2, kind: input, shape index: {}]   ;;  %s938_s3 = inlined_call_operand.vmem [shape: f32[10,20], index: 3, kind: input, shape index: {}]   ;;  %s939_s4 = inlined_call_operand.vmem [shape: f32[10,1], index: 4, kind: input, shape index: {}]   ;;  %s940_s5 = inlined_call_operand.vmem [shape: f32[5,10], index: 5, kind: input, shape index: {}]   ;;  %s941_s6 = inlined_call_operand.vmem [shape: f32[5,1], index: 6, kind: input, shape index: {}]   ;;  %s942_s7 = inlined_call_operand.vmem [shape: f32[1,5], index: 7, kind: input, shape index: {}]   ;;  %s943_s8 = inlined_call_operand.<no memory space> [shape: f32[1,1], index: 8, kind: input, shape index: {}]   ;;  %s944_s9 = inlined_call_operand.hbm [shape: f32[1,128], index: 9, kind: output, shape index: {}]  }
   0x1   :  { %v14_v0 = vstv %s943_s8 }
   0x2   :  { %15 = vst [vmem:[#allocation2] sm:$0x1] %v14_v0 }
   0x3   :  { %v38_v1 = vld [vmem:[%s935_s0] sm:$0xff]  ;;  %v39_v2 = vld [vmem:[%s935_s0 + $0x8] sm:$0xff]  ;;  %vm72_vm0 = vcmask 302080   ;;  %v730_v3 = vmov 0.0|0.0   ;;  %vm731_vm2 = vmmov 0   ;;  %v732_v6 = vmov 0.0  }
   0x4   :  { %644 = vmatprep.subr.bf16.mxu0 %v730_v3  ;;  %v645_v4 = vpack.c.bf16 %v39_v2, %v38_v1  ;;  %vm798_vm1 = vmpackc.low %vm72_vm0, %vm72_vm0  ;;  %614 = vmatprep.mubr.msk.f32.mxu0 %vm731_vm2, %v732_v6  ;;  %v733_v7 = vmov 0   ;;  %v40_v8 = vld [vmem:[%s935_s0 + $0x10] sm:$0xff]  ;;  %v41_v9 = vld [vmem:[%s935_s0 + $0x18] sm:$0xff] }
   0x5   :  { %690 = vset.pattern.permute.xlu0 %v733_v7  ;;  %691 = vset.pattern.permute.xlu1 %v733_v7  ;;  %v54_v10 = vld [vmem:[%s937_s2] sm:$0xff]  ;;  %v649_v11 = vpack.c.bf16 %v41_v9, %v40_v8  ;;  %v55_v12 = vld [vmem:[%s937_s2 + $0x8] sm:$0xff]  ;;  %v56_v13 = vld [vmem:[%s937_s2 + $0x10] sm:$0xf] }
   0x6   :  { %647 = vmatpush3.bf16.xpose.msk.msra.mxu0 %vm798_vm1, %v645_v4  ;;  %59 = vperm.xlu0 %690, %v54_v10  }
   0x7   :  { %648 = vmatprep.subr.bf16.mxu0 %v730_v3  ;;  %69 = vperm.xlu1 %691, %v56_v13  }
   0x8   :  { %16 = vsyncpa [#allocation4], 0  ;;  %v224_v14 = vld [vmem:[%s939_s4] sm:$0xff]  ;;  %v43_v16 = vld [vmem:[%s935_s0 + $0x28] sm:$0xff]  ;;  %vm236_vm3 = vcmask 162816   ;;  %vm243_vm4 = vcmask 1043456  }
   0x9   :  { %v42_v15 = vld [vmem:[%s935_s0 + $0x20] sm:$0xff]  ;;  %v225_v17 = vld [vmem:[%s939_s4 + $0x8] sm:$0x3]  ;;  %v44_v21 = vld [vmem:[%s935_s0 + $0x30] sm:$0xff]  ;;  %vm341_vm5 = vcmask 1041408   ;;  %vm734_vm6 = vmmov 1  }
   0xa   :  { %64 = vperm.xlu0 %690, %v55_v12   ;;  %v331_v18 = vld [vmem:[%s941_s6] sm:$0x1f]  ;;  %v653_v19 = vpack.c.bf16 %v43_v16, %v42_v15  ;;  %v45_v22 = vld [vmem:[%s935_s0 + $0x38] sm:$0xff]  ;;  %v47_v25 = vld [vmem:[%s935_s0 + $0x48] sm:$0xff]  ;;  %vm337_vm8 = vcmask 80896   ;;  %vm434_vm9 = vcmask 1044480  }
   0xb   :  { %228 = vperm.xlu1 %691, %v224_v14   ;;  %v420_v20 = vld [vmem:[#allocation2] sm:$0x1]  ;;  %v657_v23 = vpack.c.bf16 %v45_v22, %v44_v21  ;;  %v48_v27 = vld [vmem:[%s935_s0 + $0x50] sm:$0xff]  ;;  %v49_v28 = vld [vmem:[%s935_s0 + $0x58] sm:$0xff]  ;;  %vm430_vm10 = vcmask 39936  }
   0xc   :  { %v46_v24 = vld [vmem:[%s935_s0 + $0x40] sm:$0xff]  ;;  %v665_v29 = vpack.c.bf16 %v49_v28, %v48_v27  ;;  %v51_v31 = vld [vmem:[%s935_s0 + $0x68] sm:$0xff]  ;;  %v52_v33 = vld [vmem:[%s935_s0 + $0x70] sm:$0xff]  ;;  %v426_v28 = vlaneseq }
   0xd   :  { %v661_v26 = vpack.c.bf16 %v47_v25, %v46_v24  ;;  %v50_v30 = vld [vmem:[%s935_s0 + $0x60] sm:$0xff]  ;;  %v53_v34 = vld [vmem:[%s935_s0 + $0x78] sm:$0xff]  ;;  %v36_v37 = vld [vmem:[%s936_s1 + $0x8] sm:$0xff] }
   0xe   :  { %651 = vmatpush3.bf16.xpose.msk.msra.mxu0 %vm798_vm1, %v649_v11  ;;  %233 = vperm.xlu0 %690, %v225_v17   ;;  %v669_v32 = vpack.c.bf16 %v51_v31, %v50_v30  ;;  %v673_v35 = vpack.c.bf16 %v53_v34, %v52_v33  ;;  %v35_v36 = vld [vmem:[%s936_s1] sm:$0xff]  ;;  %v37_v38 = vld [vmem:[%s936_s1 + $0x10] sm:$0xf]  ;;  %v223_v1 = vld [vmem:[%s938_s3 + $0x8] sm:$0x3] }
   0xf   :  { %652 = vmatprep.subr.bf16.mxu0 %v730_v3  ;;  %334 = vperm.xlu1 %691, %v331_v18   ;;  %v222_v39 = vld [vmem:[%s938_s3] sm:$0xff]  ;;  %vm682_vm7 = vmpackc.low %vm341_vm5, %vm734_vm6 }
  0x10   :  { %629 = vmatprep.mubr.msk.f32.mxu1 %vm236_vm3, %v222_v39  ;;  %v330_v18 = vld [vmem:[%s940_s5] sm:$0x1f]  ;;  %s735_s5 = smov [#allocation3]  }
  0x11   :  { %v419_v27 = vld [vmem:[%s942_s7] sm:$0x1]  ;;  %s519_s15 = sshll.u32 %s735_s5, 4  ;;  %s520_s15 = int_to_ptr.vmem [resolvable:$true] %s519_s15 }
  0x12   :  { %423 = vperm.xlu0 %690, %v420_v20   ;;  %s706_s7 = scalar_lea.vmem %s520_s15, 16  ;;  %s710_s16 = scalar_lea.vmem %s520_s15, 32 }
  0x13   :  { %p707_p0 = scmp.ne.s32.totalorder %s520_s15, %s706_s7  ;;  %p711_p1 = scmp.lt.s32.totalorder %s520_s15, %s520_s15 }
  0x14   :  { %p712_p2 = scmp.lt.s32.totalorder %s710_s16, %s706_s7 }
  0x16   :  { %655 = vmatpush3.bf16.xpose.msk.msra.mxu0 %vm798_vm1, %v653_v19  ;;  %p713_p3 = por %p712_p2, %p711_p1 }
  0x17   :  { %656 = vmatprep.subr.bf16.mxu0 %v730_v3 }
  0x18   :  { %p714_p4 = pnand %p713_p3, %p707_p0 }
  0x1e   :  { %659 = vmatpush3.bf16.xpose.msk.msra.mxu0 %vm798_vm1, %v657_v23 }
  0x1f   :  { %660 = vmatprep.subr.bf16.mxu0 %v730_v3 }
  0x26   :  { %663 = vmatpush3.bf16.xpose.msk.msra.mxu0 %vm798_vm1, %v661_v26 }
  0x27   :  { %664 = vmatprep.subr.bf16.mxu0 %v730_v3 }
  0x2e   :  { %667 = vmatpush3.bf16.xpose.msk.msra.mxu0 %vm798_vm1, %v665_v29  ;;  %v427_v29 = vshrl.u32 %v426_v28, 7 }
  0x2f   :  { %668 = vmatprep.subr.bf16.mxu0 %v730_v3 }
  0x36   :  { %671 = vmatpush3.bf16.xpose.msk.msra.mxu0 %vm798_vm1, %v669_v32 }
  0x37   :  { %672 = vmatprep.subr.bf16.mxu0 %v730_v3 }
  0x3e   :  { %675 = vmatpush3.bf16.xpose.msk.msra.mxu0 %vm798_vm1, %v673_v35 }
  0x45   :  { %615 = vmatmul.mubr.msk.f32.vlgmr.msra.gmra.mrb[0].mxu0 %vm72_vm0, %v35_v36 }
  0x46   :  { %617 = vmatprep.mubr.msk.f32.mxu0 %vm731_vm2, %v732_v6 }
  0x49   :  { %618 = vmatmul.mubr.msk.f32.gmra.mrb[2].mxu0 %vm72_vm0, %v36_v37 }
  0x4a   :  { %620 = vmatprep.mubr.msk.f32.mxu0 %vm731_vm2, %v732_v6 }
  0x4d   :  { %621 = vmatmul.mubr.msk.f32.gmra.mrb[4].mxu0 %vm72_vm0, %v37_v38 }
  0x85   :  { %v60_v40 = vpop.permute.xlu0 %59 }
  0x86   :  { %v70_v50 = vpop.permute.xlu1 %69 }
  0x89   :  { %v65_v45 = vpop.permute.xlu0 %64 }
  0x8a   :  { %v229_v5 = vpop.permute.xlu1 %228 }
  0x8d   :  { %v234_v2 = vpop.permute.xlu0 %233 }
  0x8e   :  { %v335_v19 = vpop.permute.xlu1 %334 }
  0x91   :  { %v424_v30 = vpop.permute.xlu0 %423 }
 0x118   :  { %v196_v41 = vpop.f32.mrb[0].mxu0 }
 0x119   :  { %v197_v42 = vadd.f32 %v196_v41, %v60_v40  ;;  %v616_v43 = vpop.f32.mrb[1].mxu0 }
 0x11b   :  { %v210_v44 = vmul.f32 0.5, %v197_v42 }
 0x11c   :  { %v201_v46 = vpop.f32.mrb[2].mxu0 }
 0x11d   :  { %692 = vtanh.f32 %v210_v44  ;;  %v202_v47 = vadd.f32 %v201_v46, %v65_v45  ;;  %v619_v48 = vpop.f32.mrb[3].mxu0 }
 0x11f   :  { %v211_v49 = vmul.f32 0.5, %v202_v47 }
 0x120   :  { %v206_v51 = vpop.f32.mrb[4].mxu0 }
 0x121   :  { %694 = vtanh.f32 %v211_v49  ;;  %v207_v52 = vadd.f32 %v206_v51, %v70_v50  ;;  %v622_v53 = vpop.f32.mrb[5].mxu0 }
 0x123   :  { %v212_v54 = vmul.f32 0.5, %v207_v52 }
 0x125   :  { %696 = vtanh.f32 %v212_v54 }
 0x127   :  { %v693_v55 = vpop.eup %692 }
 0x128   :  { %v216_v56 = vadd.f32 1.0, %v693_v55 }
 0x12a   :  { %v219_v59 = vmul.f32 0.5, %v216_v56 }
 0x12b   :  { %v695_v57 = vpop.eup %694 }
 0x12c   :  { %v217_v58 = vadd.f32 1.0, %v695_v57 }
 0x12e   :  { %v220_v60 = vmul.f32 0.5, %v217_v58 }
 0x12f   :  { %v697_v61 = vpop.eup %696 }
 0x130   :  { %v218_v62 = vadd.f32 1.0, %v697_v61  ;;  %v676_v63 = vpack.c.bf16 %v220_v60, %v219_v59 }
 0x132   :  { %v221_v0 = vmul.f32 0.5, %v218_v62  ;;  %677 = vmatprep.subr.bf16.mxu1 %v676_v63 }
 0x133   :  { %679 = vmatpush3.bf16.msra.mxu1 %v676_v63 }
 0x134   :  { %627 = vmatprep.subr.msk.mxu1 %vm243_vm4, %v221_v0 }
 0x137   :  { %628 = vmatpush3.msk.msra.mxu1 %vm243_vm4, %v221_v0 }
 0x138   :  { %630 = vmatmul.mubr.msk.f32.vlgmr.msra.gmra.mrb[0].mxu1 %vm236_vm3, %v223_v1  ;;  %680 = vmatprep.subr.bf16.mxu1 %v730_v3 }
 0x139   :  { %636 = vmatprep.mubr.msk.f32.mxu1 %vm731_vm2, %v732_v6 }
 0x20b   :  { %v631_v4 = vpop.f32.mrb[0].mxu1 }
 0x20c   :  { %v319_v7 = vadd.f32 %v631_v4, %v234_v2  ;;  %v313_v8 = vpop.f32.mrb[1].mxu1 }
 0x20d   :  { %v314_v9 = vadd.f32 %v313_v8, %v229_v5 }
 0x20e   :  { %v323_v10 = vmul.f32 0.5, %v319_v7 }
 0x20f   :  { %v322_v11 = vmul.f32 0.5, %v314_v9 }
 0x210   :  { %698 = vtanh.f32 %v323_v10 }
 0x211   :  { %700 = vtanh.f32 %v322_v11 }
 0x21a   :  { %v699_v12 = vpop.eup %698 }
 0x21b   :  { %v701_v13 = vpop.eup %700  ;;  %v327_v14 = vadd.f32 1.0, %v699_v12 }
 0x21c   :  { %v326_v15 = vadd.f32 1.0, %v701_v13 }
 0x21d   :  { %v329_v16 = vmul.f32 0.5, %v327_v14 }
 0x21e   :  { %v328_v3 = vmul.f32 0.5, %v326_v15 }
 0x220   :  { %v681_v17 = vpack.c.bf16 %v329_v16, %v328_v3 }
 0x222   :  { %683 = vmatpush3.bf16.msk.msra.mxu1 %vm682_vm7, %v681_v17 }
 0x223   :  { %639 = vmatprep.subr.mxu1 %v732_v6 }
 0x225   :  { %637 = vmatmul.mubr.msk.f32.vlgmr.msra.gmra.mrb[2].mxu1 %vm337_vm8, %v330_v18 }
 0x226   :  { %641 = vmatprep.mubr.msk.f32.mxu1 %vm731_vm2, %v732_v6  ;;  %v428_v6 = vsub.s32 0, %v427_v29 }
 0x228   :  { %v429_v31 = vrot.slane %v424_v30, %v428_v6 }
 0x2f8   :  { %v411_v20 = vpop.f32.mrb[2].mxu1 }
 0x2f9   :  { %v412_v21 = vadd.f32 %v411_v20, %v335_v19  ;;  %v638_v22 = vpop.f32.mrb[3].mxu1 }
 0x2fb   :  { %v415_v23 = vmul.f32 0.5, %v412_v21 }
 0x2fd   :  { %702 = vtanh.f32 %v415_v23 }
 0x307   :  { %v703_v24 = vpop.eup %702 }
 0x308   :  { %v417_v25 = vadd.f32 1.0, %v703_v24 }
 0x30a   :  { %v418_v26 = vmul.f32 0.5, %v417_v25 }
 0x30c   :  { %640 = vmatpush3.msk.msra.mxu1 %vm434_vm9, %v418_v26 }
 0x30d   :  { %642 = vmatmul.mubr.msk.f32.vlgmr.msra.gmra.mrb[4].mxu1 %vm430_vm10, %v419_v27 }
 0x3e0   :  { %v504_v32 = vpop.f32.mrb[4].mxu1 }
 0x3e1   :  { %v505_v33 = vadd.f32 %v504_v32, %v429_v31  ;;  %v643_v34 = vpop.f32.mrb[5].mxu1 }
 0x3e3   :  { %v508_v35 = vmul.f32 0.5, %v505_v33 }
 0x3e5   :  { %704 = vtanh.f32 %v508_v35 }
 0x3ef   :  { %v705_v36 = vpop.eup %704 }
 0x3f0   :  { %v510_v37 = vadd.f32 1.0, %v705_v36 }
 0x3f2   :  { %v511_v38 = vmul.f32 0.5, %v510_v37 }
 0x3f4   :  { %512 = vst [vmem:[#allocation3] sm:$0x1] %v511_v38 }
 0x3f5   :  { %717 = shalt.err (!%p714_p4)
}
 0x3f6   :  { %s718_s19 = scalar_lea.hbm %s944_s9, 16 }
 0x3f7   :  { %p719_p5 = scmp.ne.s32.totalorder %s944_s9, %s718_s19  ;;  %p722_p6 = scmp.lt.u32.totalorder %s718_s19, %s944_s9 }
 0x3f9   :  { %p724_p7 = pnand %p722_p6, %p719_p5 }
 0x3fb   :  { %727 = shalt.err (!%p724_p7)
}
 0x3fc   :  { %522 = dma.vmem_to_hbm [thread:$0]  %s520_s15, 16, %s944_s9, [#allocation4]  }
 0x3fd   :  { %728 = dma.done.wait [#allocation4], 16  }
 0x3fe   :  { %729 = vsyncadd [#allocation4], 4294967280 }
 0x3ff   :  { %526 = vsyncpa [#allocation4], 1 }

</bundles_post_ra>
